<compile_context>
chip_gen: v5e
topology: v5e:2x2
jax: 0.10.0
libtpu: 0.0.40
codegen_flags: <defaults>
</compile_context>

<pallas_src>
import functools

import jax
import jax.numpy as jnp
from jax.experimental import pallas as pl
from jax.experimental.pallas import tpu as pltpu

KSIZE = 7
PAD = 3
_CT_MAX = 16  # max channels folded into one grid step


def _pick_channel_tile(C):
    """Largest divisor of C that is <= _CT_MAX (so blocks never run ragged)."""
    for ct in range(min(C, _CT_MAX), 0, -1):
        if C % ct == 0:
            return ct
    return 1


def _build_col_mix(weight, W):
    """(2*7*W, W) banded matrix folding the 7x7 weights' column taps.

    Row block (c*KSIZE + u) of size W holds M[c, u] with
        M[c, u][a, j] = weight[0, c, u, a - j + PAD]   if |a - j| <= PAD else 0
    so that  conv7x7(concat([avg, mx])) = Q @ Mall  with
        Q = [rowshift_0(avg) .. rowshift_6(avg) rowshift_0(mx) .. rowshift_6(mx)]
    (rowshift_u(P)[i, :] = P[i + u - PAD, :], zero-filled at the borders).
    """
    w = weight.reshape(2, KSIZE, KSIZE).astype(jnp.float32)     # (c, u, v)
    a = jnp.arange(W)[:, None]
    j = jnp.arange(W)[None, :]
    v = a - j + PAD                                             # (W, W)
    valid = (v >= 0) & (v < KSIZE)
    vc = jnp.clip(v, 0, KSIZE - 1)
    M = jnp.where(valid[None, None], w[:, :, vc], 0.0)          # (2, 7, W, W)
    return M.reshape(2 * KSIZE * W, W)                          # (14W, W)


def _spatial_attention_kernel(x_ref, mall_ref, b_ref, o_ref,
                              sum_acc, max_acc, *, c_total):
    # x_ref:    (1, Ct, H, W) VMEM block (one batch element, Ct channels)
    # mall_ref: (14W, W)      weight-folded column-mix matrix (grid-invariant)
    # b_ref:    (1,)          conv bias, SMEM scalar
    # o_ref:    (1, 1, H, W)  output block (resident across the cb axis)
    # sum_acc / max_acc: (H, W) f32 VMEM scratch accumulators
    cb = pl.program_id(1)
    n_cb = pl.num_programs(1)
    _, ct, H, W = x_ref.shape

    # ---- init the running channel reductions on the first channel block ----
    @pl.when(cb == 0)
    def _():
        sum_acc[...] = jnp.zeros_like(sum_acc)
        max_acc[...] = jnp.full(max_acc.shape, -jnp.inf, dtype=max_acc.dtype)

    # ---- pool this (Ct, H, W) channel block (VPU adds / maxes) ----
    s = sum_acc[...]
    m = max_acc[...]
    for c in range(ct):                      # Ct <= 16, bounded static unroll
        xc = x_ref[0, c].astype(jnp.float32)
        s = s + xc
        m = jnp.maximum(m, xc)
    sum_acc[...] = s
    max_acc[...] = m

    # ---- finalize: 7x7 conv as ONE fused MXU matmul, sigmoid, store ----
    @pl.when(cb == n_cb - 1)
    def _():
        avg = sum_acc[...] * (1.0 / float(c_total))
        mx = max_acc[...]

        # Row shifts via zero-padded static slices (no S matmuls, no O(H^2) operand).
        zrow = jnp.zeros((PAD, W), jnp.float32)
        shifted = []
        for p in (avg, mx):
            pp = jnp.concatenate([zrow, p, zrow], axis=0)       # (H + 6, W)
            for u in range(KSIZE):
                shifted.append(pp[u:u + H, :])                  # rowshift_u(p)
        q = jnp.concatenate(shifted, axis=1)                    # (H, 14W)

        out = jnp.dot(q, mall_ref[...], preferred_element_type=jnp.float32)
        out = out + b_ref[0]                                    # scalar bias (SMEM)
        o_ref[0, 0] = jax.nn.sigmoid(out).astype(o_ref.dtype)


def spatial_attention_forward(x, weight, bias):
    """x: (B, C, H, W); weight: (1, 2, 7, 7); bias: (1,). Returns (B, 1, H, W)."""
    B, C, H, W = x.shape
    ct = _pick_channel_tile(C)
    n_cb = C // ct

    mall = _build_col_mix(weight, W)                            # (14W, W) f32
    b1 = bias.reshape(1).astype(jnp.float32)

    kernel = functools.partial(_spatial_attention_kernel, c_total=C)

    # Rough VMEM footprint: x block (double-buffered) + Mall (double-buffered)
    # + output block + accumulators + in-kernel temporaries (q / shifted slices).
    bpe = jnp.dtype(x.dtype).itemsize
    est = (2 * ct * H * W * bpe
           + 2 * 2 * KSIZE * W * W * 4
           + 2 * H * W * bpe
           + 2 * H * W * 4
           + 4 * H * 2 * KSIZE * W * 4)
    vmem_limit = None
    if est > (32 << 20):
        vmem_limit = min(est + (8 << 20), 100 << 20)

    return pl.pallas_call(
        kernel,
        out_shape=jax.ShapeDtypeStruct((B, 1, H, W), x.dtype),
        grid_spec=pltpu.PrefetchScalarGridSpec(
            num_scalar_prefetch=0,
            grid=(B, n_cb),
            in_specs=[
                pl.BlockSpec((1, ct, H, W), lambda b, cb: (b, cb, 0, 0)),
                pl.BlockSpec((2 * KSIZE * W, W), lambda b, cb: (0, 0)),
                pl.BlockSpec(memory_space=pltpu.MemorySpace.SMEM),
            ],
            out_specs=pl.BlockSpec((1, 1, H, W), lambda b, cb: (b, 0, 0, 0)),
            scratch_shapes=[
                pltpu.VMEM((H, W), jnp.float32),   # running channel sum
                pltpu.VMEM((H, W), jnp.float32),   # running channel max
            ],
        ),
        compiler_params=pltpu.CompilerParams(
            dimension_semantics=("parallel", "arbitrary"),
            vmem_limit_bytes=vmem_limit,
        ),
    )(x, mall, b1)


class SpatialAttentionModule:
    """JAX/Pallas port of the PyTorch SpatialAttentionModule (forward only)."""

    def __init__(self, key=None):
        if key is None:
            key = jax.random.PRNGKey(0)
        k_w, k_b = jax.random.split(key)
        fan_in = 2 * KSIZE * KSIZE
        bound = (1.0 / fan_in) ** 0.5           # matches nn.Conv2d default bounds
        self.weight = jax.random.uniform(
            k_w, (1, 2, KSIZE, KSIZE), jnp.float32, -bound, bound)
        self.bias = jax.random.uniform(k_b, (1,), jnp.float32, -bound, bound)

    def __call__(self, x):
        return spatial_attention_forward(x, self.weight, self.bias)


def _ref_spatial_attention(x, weight, bias):
    """Pure-JAX reference (exact f32 elementwise conv) for verification."""
    B, C, H, W = x.shape
    xf = x.astype(jnp.float32)
    avg = jnp.mean(xf, axis=1)
    mx = jnp.max(xf, axis=1)
    pooled = jnp.stack([avg, mx], axis=1)                        # (B, 2, H, W)
    pp = jnp.pad(pooled, ((0, 0), (0, 0), (PAD, PAD), (PAD, PAD)))
    out = jnp.full((B, H, W), bias[0], dtype=jnp.float32)
    for c in range(2):
        for u in range(KSIZE):
            for v in range(KSIZE):
                out = out + pp[:, c, u:u + H, v:v + W] * weight[0, c, u, v]
    return jax.nn.sigmoid(out)[:, None].astype(x.dtype)


if __name__ == "__main__":
    root = jax.random.PRNGKey(0)
    k_x, k_p = jax.random.split(root)
    B, C, H, W = 2, 4, 16, 16
    x = jax.random.normal(k_x, (B, C, H, W), dtype=jnp.float32)

    module = SpatialAttentionModule(k_p)
    y = jax.block_until_ready(module(x))

    assert y.shape == (B, 1, H, W), y.shape
    y_ref = _ref_spatial_attention(x, module.weight, module.bias)
    max_err = float(jnp.max(jnp.abs(y.astype(jnp.float32) - y_ref.astype(jnp.float32))))
    if not max_err <= 5e-4:
        raise AssertionError(f"kernel/reference mismatch: max_err={max_err}")
    print("KERNEL_OK")
</pallas_src>

<mosaic_0001>
module attributes {stable_mosaic.version = 11 : i64} {
  func.func @_spatial_attention_kernel(%arg0: i32, %arg1: i32, %arg2: memref<1x4x16x16xf32, #tpu.memory_space<vmem>>, %arg3: memref<224x16xf32, #tpu.memory_space<vmem>>, %arg4: memref<1xf32, #tpu.memory_space<smem>>, %arg5: memref<1x1x16x16xf32, #tpu.memory_space<vmem>>, %arg6: memref<16x16xf32, #tpu.memory_space<vmem>>, %arg7: memref<16x16xf32, #tpu.memory_space<vmem>>) attributes {dimension_semantics = [#tpu.dimension_semantics<parallel>, #tpu.dimension_semantics<arbitrary>], iteration_bounds = array<i64: 2, 1>, scalar_prefetch = 0 : i64, scratch_operands = 2 : i64, tpu.core_type = #tpu.core_type<tc>, window_params = [{transform_indices = @transform_0, window_bounds = array<i64: 1, 4, 16, 16>}, {pipeline_mode = #tpu.pipeline_mode<synchronous>, transform_indices = @transform_1, window_bounds = array<i64: 224, 16>}, {transform_indices = @transform_2, window_bounds = array<i64: 1>}, {transform_indices = @transform_3, window_bounds = array<i64: 1, 1, 16, 16>}]} {
    %c0_i32 = arith.constant 0 : i32
    %0 = arith.cmpi eq, %arg1, %c0_i32 : i32
    %1 = arith.extui %0 : i1 to i32
    %c0_i32_0 = arith.constant 0 : i32
    %2 = arith.cmpi ne, %1, %c0_i32_0 : i32
    scf.if %2 {
      %cst = arith.constant 0.000000e+00 : f32
      %26 = vector.broadcast %cst : f32 to vector<16x16xf32>
      %c0_23 = arith.constant 0 : index
      %c0_24 = arith.constant 0 : index
      %27 = vector.load %arg6[%c0_23, %c0_24] : memref<16x16xf32, #tpu.memory_space<vmem>>, vector<16x16xf32>
      tpu.vector_store %arg6[%c0_23, %c0_24], %26 {strides = array<i32>} : memref<16x16xf32, #tpu.memory_space<vmem>>, vector<16x16xf32>,
      %cst_25 = arith.constant 0xFF800000 : f32
      %28 = vector.broadcast %cst_25 : f32 to vector<16x16xf32>
      %c0_26 = arith.constant 0 : index
      %c0_27 = arith.constant 0 : index
      %29 = vector.load %arg7[%c0_26, %c0_27] : memref<16x16xf32, #tpu.memory_space<vmem>>, vector<16x16xf32>
      tpu.vector_store %arg7[%c0_26, %c0_27], %28 {strides = array<i32>} : memref<16x16xf32, #tpu.memory_space<vmem>>, vector<16x16xf32>,
    } else {
    }
    %c0 = arith.constant 0 : index
    %c0_1 = arith.constant 0 : index
    %3 = vector.load %arg6[%c0, %c0_1] : memref<16x16xf32, #tpu.memory_space<vmem>>, vector<16x16xf32>
    %c0_2 = arith.constant 0 : index
    %c0_3 = arith.constant 0 : index
    %4 = vector.load %arg7[%c0_2, %c0_3] : memref<16x16xf32, #tpu.memory_space<vmem>>, vector<16x16xf32>
    %c0_4 = arith.constant 0 : index
    %c0_5 = arith.constant 0 : index
    %c0_6 = arith.constant 0 : index
    %c0_7 = arith.constant 0 : index
    %5 = vector.load %arg2[%c0_4, %c0_5, %c0_6, %c0_7] : memref<1x4x16x16xf32, #tpu.memory_space<vmem>>, vector<1x1x16x16xf32>
    %6 = vector.shape_cast %5 : vector<1x1x16x16xf32> to vector<16x16xf32>
    %7 = arith.addf %3, %6 : vector<16x16xf32>
    %8 = arith.maximumf %4, %6 : vector<16x16xf32>
    %c0_8 = arith.constant 0 : index
    %c1 = arith.constant 1 : index
    %c0_9 = arith.constant 0 : index
    %c0_10 = arith.constant 0 : index
    %9 = vector.load %arg2[%c0_8, %c1, %c0_9, %c0_10] : memref<1x4x16x16xf32, #tpu.memory_space<vmem>>, vector<1x1x16x16xf32>
    %10 = vector.shape_cast %9 : vector<1x1x16x16xf32> to vector<16x16xf32>
    %11 = arith.addf %7, %10 : vector<16x16xf32>
    %12 = arith.maximumf %8, %10 : vector<16x16xf32>
    %c0_11 = arith.constant 0 : index
    %c2 = arith.constant 2 : index
    %c0_12 = arith.constant 0 : index
    %c0_13 = arith.constant 0 : index
    %13 = vector.load %arg2[%c0_11, %c2, %c0_12, %c0_13] : memref<1x4x16x16xf32, #tpu.memory_space<vmem>>, vector<1x1x16x16xf32>
    %14 = vector.shape_cast %13 : vector<1x1x16x16xf32> to vector<16x16xf32>
    %15 = arith.addf %11, %14 : vector<16x16xf32>
    %16 = arith.maximumf %12, %14 : vector<16x16xf32>
    %c0_14 = arith.constant 0 : index
    %c3 = arith.constant 3 : index
    %c0_15 = arith.constant 0 : index
    %c0_16 = arith.constant 0 : index
    %17 = vector.load %arg2[%c0_14, %c3, %c0_15, %c0_16] : memref<1x4x16x16xf32, #tpu.memory_space<vmem>>, vector<1x1x16x16xf32>
    %18 = vector.shape_cast %17 : vector<1x1x16x16xf32> to vector<16x16xf32>
    %19 = arith.addf %15, %18 : vector<16x16xf32>
    %20 = arith.maximumf %16, %18 : vector<16x16xf32>
    %c0_17 = arith.constant 0 : index
    %c0_18 = arith.constant 0 : index
    %21 = vector.load %arg6[%c0_17, %c0_18] : memref<16x16xf32, #tpu.memory_space<vmem>>, vector<16x16xf32>
    tpu.vector_store %arg6[%c0_17, %c0_18], %19 {strides = array<i32>} : memref<16x16xf32, #tpu.memory_space<vmem>>, vector<16x16xf32>,
    %c0_19 = arith.constant 0 : index
    %c0_20 = arith.constant 0 : index
    %22 = vector.load %arg7[%c0_19, %c0_20] : memref<16x16xf32, #tpu.memory_space<vmem>>, vector<16x16xf32>
    tpu.vector_store %arg7[%c0_19, %c0_20], %20 {strides = array<i32>} : memref<16x16xf32, #tpu.memory_space<vmem>>, vector<16x16xf32>,
    %c0_i32_21 = arith.constant 0 : i32
    %23 = arith.cmpi eq, %arg1, %c0_i32_21 : i32
    %24 = arith.extui %23 : i1 to i32
    %c0_i32_22 = arith.constant 0 : i32
    %25 = arith.cmpi ne, %24, %c0_i32_22 : i32
    scf.if %25 {
      %c0_23 = arith.constant 0 : index
      %c0_24 = arith.constant 0 : index
      %26 = vector.load %arg6[%c0_23, %c0_24] : memref<16x16xf32, #tpu.memory_space<vmem>>, vector<16x16xf32>
      %cst = arith.constant 2.500000e-01 : f32
      %27 = vector.broadcast %cst : f32 to vector<16x16xf32>
      %28 = arith.mulf %26, %27 : vector<16x16xf32>
      %c0_25 = arith.constant 0 : index
      %c0_26 = arith.constant 0 : index
      %29 = vector.load %arg7[%c0_25, %c0_26] : memref<16x16xf32, #tpu.memory_space<vmem>>, vector<16x16xf32>
      %cst_27 = arith.constant 0.000000e+00 : f32
      %30 = vector.broadcast %cst_27 : f32 to vector<3x16xf32>
      %31 = tpu.concatenate %30, %28, %30 in 0 : vector<3x16xf32>, vector<16x16xf32>, vector<3x16xf32> -> vector<22x16xf32>
      %32 = vector.extract_strided_slice %31 {offsets = [0, 0], sizes = [16, 16], strides = [1, 1]} : vector<22x16xf32> to vector<16x16xf32>
      %33 = vector.extract_strided_slice %31 {offsets = [1, 0], sizes = [16, 16], strides = [1, 1]} : vector<22x16xf32> to vector<16x16xf32>
      %34 = vector.extract_strided_slice %31 {offsets = [2, 0], sizes = [16, 16], strides = [1, 1]} : vector<22x16xf32> to vector<16x16xf32>
      %35 = vector.extract_strided_slice %31 {offsets = [3, 0], sizes = [16, 16], strides = [1, 1]} : vector<22x16xf32> to vector<16x16xf32>
      %36 = vector.extract_strided_slice %31 {offsets = [4, 0], sizes = [16, 16], strides = [1, 1]} : vector<22x16xf32> to vector<16x16xf32>
      %37 = vector.extract_strided_slice %31 {offsets = [5, 0], sizes = [16, 16], strides = [1, 1]} : vector<22x16xf32> to vector<16x16xf32>
      %38 = vector.extract_strided_slice %31 {offsets = [6, 0], sizes = [16, 16], strides = [1, 1]} : vector<22x16xf32> to vector<16x16xf32>
      %39 = tpu.concatenate %30, %29, %30 in 0 : vector<3x16xf32>, vector<16x16xf32>, vector<3x16xf32> -> vector<22x16xf32>
      %40 = vector.extract_strided_slice %39 {offsets = [0, 0], sizes = [16, 16], strides = [1, 1]} : vector<22x16xf32> to vector<16x16xf32>
      %41 = vector.extract_strided_slice %39 {offsets = [1, 0], sizes = [16, 16], strides = [1, 1]} : vector<22x16xf32> to vector<16x16xf32>
      %42 = vector.extract_strided_slice %39 {offsets = [2, 0], sizes = [16, 16], strides = [1, 1]} : vector<22x16xf32> to vector<16x16xf32>
      %43 = vector.extract_strided_slice %39 {offsets = [3, 0], sizes = [16, 16], strides = [1, 1]} : vector<22x16xf32> to vector<16x16xf32>
      %44 = vector.extract_strided_slice %39 {offsets = [4, 0], sizes = [16, 16], strides = [1, 1]} : vector<22x16xf32> to vector<16x16xf32>
      %45 = vector.extract_strided_slice %39 {offsets = [5, 0], sizes = [16, 16], strides = [1, 1]} : vector<22x16xf32> to vector<16x16xf32>
      %46 = vector.extract_strided_slice %39 {offsets = [6, 0], sizes = [16, 16], strides = [1, 1]} : vector<22x16xf32> to vector<16x16xf32>
      %47 = tpu.concatenate %32, %33, %34, %35, %36, %37, %38, %40, %41, %42, %43, %44, %45, %46 in 1 : vector<16x16xf32>, vector<16x16xf32>, vector<16x16xf32>, vector<16x16xf32>, vector<16x16xf32>, vector<16x16xf32>, vector<16x16xf32>, vector<16x16xf32>, vector<16x16xf32>, vector<16x16xf32>, vector<16x16xf32>, vector<16x16xf32>, vector<16x16xf32>, vector<16x16xf32> -> vector<16x224xf32>
      %c0_28 = arith.constant 0 : index
      %c0_29 = arith.constant 0 : index
      %48 = vector.load %arg3[%c0_28, %c0_29] : memref<224x16xf32, #tpu.memory_space<vmem>>, vector<224x16xf32>
      %cst_30 = arith.constant dense<0.000000e+00> : vector<16x16xf32>
      %49 = tpu.matmul %47, %48, %cst_30 {dimension_numbers = #tpu.dot_dimension_numbers<[1], [0], [0], [1], [0, 0, 1, 1], [], []>} : vector<16x224xf32>, vector<224x16xf32>, vector<16x16xf32> -> vector<16x16xf32>
      %c0_31 = arith.constant 0 : index
      %50 = memref.load %arg4[%c0_31] : memref<1xf32, #tpu.memory_space<smem>>
      %51 = vector.broadcast %50 : f32 to vector<16x16xf32>
      %52 = arith.addf %49, %51 : vector<16x16xf32>
      %53 = arith.negf %52 : vector<16x16xf32>
      %54 = math.exp %53 : vector<16x16xf32>
      %cst_32 = arith.constant 1.000000e+00 : f32
      %55 = vector.broadcast %cst_32 : f32 to vector<16x16xf32>
      %56 = arith.addf %55, %54 : vector<16x16xf32>
      %57 = arith.divf %55, %56 : vector<16x16xf32>
      %c0_33 = arith.constant 0 : index
      %c0_34 = arith.constant 0 : index
      %c0_35 = arith.constant 0 : index
      %c0_36 = arith.constant 0 : index
      %58 = vector.load %arg5[%c0_33, %c0_34, %c0_35, %c0_36] : memref<1x1x16x16xf32, #tpu.memory_space<vmem>>, vector<1x1x16x16xf32>
      %59 = vector.shape_cast %58 : vector<1x1x16x16xf32> to vector<16x16xf32>
      %60 = vector.shape_cast %57 : vector<16x16xf32> to vector<1x1x16x16xf32>
      tpu.vector_store %arg5[%c0_33, %c0_34, %c0_35, %c0_36], %60 {strides = array<i32>} : memref<1x1x16x16xf32, #tpu.memory_space<vmem>>, vector<1x1x16x16xf32>,
    } else {
    }
    return
  }
  func.func @transform_0(%arg0: i32, %arg1: i32) -> (i32, i32, i32, i32) {
    %c0_i32 = arith.constant 0 : i32
    %c0_i32_0 = arith.constant 0 : i32
    %c0_i32_1 = arith.constant 0 : i32
    return %arg0, %arg1, %c0_i32, %c0_i32_0 : i32, i32, i32, i32
  }
  func.func @transform_1(%arg0: i32, %arg1: i32) -> (i32, i32) {
    %c0_i32 = arith.constant 0 : i32
    %c0_i32_0 = arith.constant 0 : i32
    %c0_i32_1 = arith.constant 0 : i32
    return %c0_i32, %c0_i32_0 : i32, i32
  }
  func.func @transform_2(%arg0: i32, %arg1: i32) -> i32 {
    %c0_i32 = arith.constant 0 : i32
    %c0_i32_0 = arith.constant 0 : i32
    return %c0_i32 : i32
  }
  func.func @transform_3(%arg0: i32, %arg1: i32) -> (i32, i32, i32, i32) {
    %c0_i32 = arith.constant 0 : i32
    %c0_i32_0 = arith.constant 0 : i32
    %c0_i32_1 = arith.constant 0 : i32
    %c0_i32_2 = arith.constant 0 : i32
    return %arg0, %c0_i32, %c0_i32_0, %c0_i32_1 : i32, i32, i32, i32
  }
}

</mosaic_0001>

<bundles_post_ra>
// kernel: tpu_custom_call.1
= control target key start
LH: loop header
LB: loop body
LE: loop exit
PB: predicated region body
PF: predicated region fallthrough
CT: control target
= control target key end

     0   :  { %s1264_s0 = inlined_call_operand.vmem [shape: f32[2,4,16,16], index: 0, kind: input, shape index: {}]   ;;  %s1265_s1 = inlined_call_operand.vmem [shape: f32[224,16], index: 1, kind: input, shape index: {}]   ;;  %s1266_s2 = inlined_call_operand.<no memory space> [shape: f32[1], index: 2, kind: input, shape index: {}]   ;;  %s1267_s3 = inlined_call_operand.hbm [shape: f32[2,1,16,16], index: 3, kind: output, shape index: {}]  }
   0x1   :  { %8 = sst [smem:[#allocation4]] %s1266_s2 }
   0x2   :  { %9 = vsyncpa [#allocation6], 0 }
   0x3   :  { %11 = vsyncpa [#allocation6 + $0x1], 0  ;;  %s929_s14 = smov 0   ;;  %s931_s15 = smov 0  }
   0x4   :  { %s933_s16 = smov 0   ;;  %s935_s17 = smov 0  }
   0x5   :  { %s937_s18 = smov 0   ;;  %s939_s19 = smov 0  }
   0x6 LB: > { %s665_s2 = sadd.s32 4294967295, %s893_s19   ;;  %s666_s20 = sadd.s32 4294967294, %s893_s19   ;;  %s893_s19 = sphi %s939_s19, %s17_s19   ;;  %s889_s18 = sphi %s937_s18, %s1274_s18   ;;  %s885_s17 = sphi %s935_s17, %s1273_s17   ;;  %s881_s16 = sphi %s933_s16, %s1272_s16   ;;  %s877_s15 = sphi %s931_s15, %s1271_s15   ;;  %s873_s14 = sphi %s929_s14, %s1270_s14  }
   0x7   : > { %s29_s21 = sadd.s32 1, %s889_s18  ;;  %s106_s22 = sadd.s32 1, %s881_s16 }
   0x8   : > { %p31_p0 = scmp.ge.s32.totalorder %s29_s21, 2  ;;  %p116_p1 = scmp.ne.s32.totalorder %s881_s16, %s877_s15 }
   0x9   : > { %p117_p2 = scmp.eq.s32.totalorder %s665_s2, 1  ;;  %p122_p3 = scmp.ne.s32.totalorder %s877_s15, %s873_s14 }
   0xa   : > { %s1276_s21 = smov (%p31_p0, %s29_s21), 0  ;;  %p123_p5 = scmp.eq.s32.totalorder %s666_s20, 1 }
   0xb   : > { %p969_p4 = por %p117_p2, %p116_p1  ;;  %s103_s24 = ssub.s32 %s889_s18, %s1276_s21 }
   0xc   : > { %p669_p6 = scmp.ge.s32.totalorder %s893_s19, 1  ;;  %p104_p7 = scmp.eq.s32.totalorder %s103_s24, 0 }
   0xd   : > { %p976_p8 = por %p123_p5, %p122_p3  ;;  %p161_p9 = scmp.lt.s32.totalorder %s893_s19, 3 }
   0xe   : > { %s982_s26 = scalar_select %p104_p7, %s881_s16, %s106_s22  }
   0xf   : > { %p162_p10 = pnand %p669_p6, %p161_p9 }
  0x10   : > { %p191_p11 = scmp.lt.s32.totalorder (!%p162_p10), %s885_s17, 1  ;;  %s897_s5 = smov (!%p162_p10), 112  }
  0x11   : > { %165 = sbr.rel (%p162_p10) target bundleno = 372 (0x174), region = 32  ;;  %s898_s6 = smov (!%p162_p10), 64  }
  0x12   : > { %s899_s7 = smov (!%p162_p10), 16   ;;  %s900_s8 = smov (!%p162_p10), 32  }
  0x13   : > { %s901_s13 = smov (!%p162_p10), 48   ;;  %s902_s2 = smov (!%p162_p10), 80  }
  0x14   : > { %s903_s20 = smov (!%p162_p10), 96   ;;  %s689_s24 = sshll.u32 (!%p162_p10), %s885_s17, 4 }
  0x15   : > { %s582_s30 = scalar_lea.hbm (!%p162_p10), %s1267_s3, %s689_s24  ;;  %s835_s10 = scalar_lea.hbm (!%p162_p10), %s1267_s3, 32 }
  0x16   : > { %vm205_vm0 = vcmask 130048   ;;  %v895_v0 = vmov 0.0   ;;  %s192_s27 = scalar_select %p191_p11, %s885_s17, 1  ;;  %v896_v1 = vmov -inf   ;;  %vm257_vm1 = vcmask 1042432  }
  0x17   : > { %206 = vst.msk [vmem:[#allocation2] sm:$0xff] %vm205_vm0, %v895_v0  ;;  %vm277_vm2 = vcmask 1046528   ;;  %vm289_vm3 = vcmask 1045504   ;;  %vm301_vm4 = vcmask 1044480   ;;  %vm313_vm5 = vcmask 1043456  }
  0x18   : > { %208 = vst.msk [vmem:[#allocation3] sm:$0xff] %vm205_vm0, %v896_v1  ;;  %s688_s28 = sshll.u32 %s192_s27, 6  ;;  %vm336_vm6 = vcmask 1041408   ;;  %vm420_vm7 = vcmask 261120   ;;  %vm423_vm8 = vcmask 392192   ;;  %vm426_vm9 = vcmask 523264  }
  0x19   : > { %209 = vst.msk [vmem:[#allocation3 + $0x8] sm:$0xff] %vm205_vm0, %v896_v1  ;;  %s199_s4 = scalar_lea.vmem %s1264_s0, %s688_s28  ;;  %vm429_vm10 = vcmask 654336   ;;  %vm432_vm11 = vcmask 785408   ;;  %vm435_vm12 = vcmask 916480  }
  0x1a   : > { %207 = vst.msk [vmem:[#allocation2 + $0x8] sm:$0xff] %vm205_vm0, %v895_v0  ;;  %v214_v2 = vld [vmem:[%s199_s4] sm:$0xff]  ;;  %v215_v4 = vld [vmem:[%s199_s4 + $0x8] sm:$0xff]  ;;  %v673_v6 = vld [vmem:[%s199_s4 + $0x10] sm:$0xff] }
  0x1b   : > { %v674_v10 = vld [vmem:[%s199_s4 + $0x18] sm:$0xff]  ;;  %v675_v12 = vld [vmem:[%s199_s4 + $0x20] sm:$0xff]  ;;  %v676_v16 = vld [vmem:[%s199_s4 + $0x28] sm:$0xff] }
  0x1c   : > { %v677_v19 = vld [vmem:[%s199_s4 + $0x30] sm:$0xff]  ;;  %v678_v22 = vld [vmem:[%s199_s4 + $0x38] sm:$0xff] }
  0x1e   : > { %v210_v3 = vld [vmem:[#allocation2] sm:$0xff] }
  0x1f   : > { %v212_v5 = vld [vmem:[#allocation3] sm:$0xff]  ;;  %v216_v7 = vadd.f32 %v214_v2, %v210_v3 }
  0x20   : > { %v213_v8 = vld [vmem:[#allocation3 + $0x8] sm:$0xff]  ;;  %v218_v9 = vmax.f32 %v212_v5, %v214_v2  ;;  %v474_v3 = vld [vmem:[%s1265_s1 + $0xd0] sm:$0xff] }
  0x21   : > { %v219_v11 = vmax.f32 %v213_v8, %v215_v4  ;;  %v223_v13 = vadd.f32 %v673_v6, %v216_v7  ;;  %v211_v14 = vld [vmem:[#allocation2 + $0x8] sm:$0xff]  ;;  %v475_v2 = vld [vmem:[%s1265_s1 + $0xd8] sm:$0xff] }
  0x22   : > { %v225_v15 = vmax.f32 %v218_v9, %v673_v6  ;;  %v217_v17 = vadd.f32 %v215_v4, %v211_v14  ;;  %511 = vmatpush.msra.mxu1 %v475_v2  ;;  %v455_v2 = vld [vmem:[%s1265_s1 + $0x38] sm:$0xff] }
  0x23   : > { %v226_v18 = vmax.f32 %v219_v11, %v674_v10  ;;  %v230_v20 = vadd.f32 %v675_v12, %v223_v13 }
  0x24   : > { %v232_v21 = vmax.f32 %v225_v15, %v675_v12  ;;  %v224_v23 = vadd.f32 %v674_v10, %v217_v17  ;;  %512 = vmatpush.msra.mxu1 %v474_v3  ;;  %v465_v3 = vld [vmem:[%s1265_s1 + $0x88] sm:$0xff] }
  0x25   : > { %v233_v24 = vmax.f32 %v226_v18, %v676_v16  ;;  %v237_v25 = vadd.f32 %v677_v19, %v230_v20 }
  0x26   : > { %v239_v26 = vmax.f32 %v232_v21, %v677_v19  ;;  %v231_v27 = vadd.f32 %v676_v16, %v224_v23 }
  0x27   : > { %v240_v28 = vmax.f32 %v233_v24, %v678_v22  ;;  %242 = vst.msk [vmem:[#allocation2] sm:$0xff] %vm205_vm0, %v237_v25 }
  0x28   : > { %244 = vst.msk [vmem:[#allocation3] sm:$0xff] %vm205_vm0, %v239_v26  ;;  %v238_v29 = vadd.f32 %v678_v22, %v231_v27 }
  0x29   : > { %245 = vst.msk [vmem:[#allocation3 + $0x8] sm:$0xff] %vm205_vm0, %v240_v28 }
  0x2a   : > { %243 = vst.msk [vmem:[#allocation2 + $0x8] sm:$0xff] %vm205_vm0, %v238_v29 }
  0x2e   : > { %v249_v30 = vld [vmem:[#allocation2] sm:$0xff] }
  0x2f   : > { %v253_v31 = vld [vmem:[#allocation3] sm:$0xff]  ;;  %v251_v32 = vmul.f32 0.25, %v249_v30 }
  0x30   : > { %v997_v33 = vld [vmem:[#allocation3 + $0x8] sm:$0xff]  ;;  %v268_v34 = vrot.slane %v253_v31, 5 }
  0x31   : > { %v269_v35 = vrot.slane %v997_v33, 5  ;;  %v250_v36 = vld [vmem:[#allocation2 + $0x8] sm:$0xff]  ;;  %v258_v37 = vrot.slane %v251_v32, 5 }
  0x32   : > { %v1001_v38 = vsel %vm257_vm1, 0.0, %v268_v34  ;;  %v252_v39 = vmul.f32 0.25, %v250_v36 }
  0x33   : > { %v1006_v40 = vsel %vm257_vm1, %v268_v34, %v269_v35  ;;  %v396_v41 = vrot.slane %v1001_v38, 5  ;;  %v1010_v42 = vsel %vm257_vm1, 0.0, %v258_v37  ;;  %v363_v50 = vrot.slane %v1001_v38, 2 }
  0x34   : > { %v772_v43 = vpack.i.bf16 %v1001_v38, %v1006_v40  ;;  %v397_v44 = vrot.slane %v1006_v40, 5  ;;  %v259_v45 = vrot.slane %v252_v39, 5  ;;  %v278_v46 = vrot.slane %v1010_v42, 1 }
  0x35   : > { %v364_v51 = vrot.slane %v1006_v40, 2  ;;  %v290_v58 = vrot.slane %v1010_v42, 2  ;;  %v374_v61 = vrot.slane %v1001_v38, 3  ;;  %v375_v62 = vrot.slane %v1006_v40, 3 }
  0x36   : > { %773 = vrot.lane.b32.xlu1 %v772_v43, %s897_s5  ;;  %v398_v47 = vsel %vm257_vm1, %v396_v41, %v397_v44  ;;  %v1020_v48 = vsel %vm257_vm1, %v258_v37, %v259_v45  ;;  %v1023_v49 = vsel %vm257_vm1, %v259_v45, 0.0  ;;  %v385_v63 = vrot.slane %v1001_v38, 4  ;;  %s585_s5 = sshll.u32 %s582_s30, 4  ;;  %s586_s5 = int_to_ptr.hbm [resolvable:$true] %s585_s5 }
  0x37   : > { %401 = vrot.lane.b32.xlu0 %v398_v47, %s898_s6  ;;  %v279_v52 = vrot.slane %v1020_v48, 1  ;;  %v281_v53 = vrot.slane %v1023_v49, 1  ;;  %v365_v56 = vsel %vm289_vm3, %v363_v50, %v364_v51  ;;  %v291_v59 = vrot.slane %v1020_v48, 2 }
  0x38   : > { %v293_v60 = vrot.slane %v1023_v49, 2  ;;  %v386_v0 = vrot.slane %v1006_v40, 4  ;;  %v376_v1 = vsel %vm301_vm4, %v374_v61, %v375_v62  ;;  %v407_v6 = vrot.slane %v1001_v38, 6  ;;  %v468_v61 = vld [vmem:[%s1265_s1 + $0xa0] sm:$0xff] }
  0x39   : > { %v280_v54 = vsel %vm277_vm2, %v278_v46, %v279_v52  ;;  %v282_v55 = vsel %vm277_vm2, %v279_v52, %v281_v53  ;;  %379 = vrot.lane.b32.xlu2 %v376_v1, %s900_s8  ;;  %v292_v4 = vsel %vm289_vm3, %v290_v58, %v291_v59  ;;  %v408_v7 = vrot.slane %v1006_v40, 6  ;;  %v473_v52 = vld [vmem:[%s1265_s1 + $0xc8] sm:$0xff]  ;;  %v472_v53 = vld [vmem:[%s1265_s1 + $0xc0] sm:$0xff]  ;;  %v459_v58 = vld [vmem:[%s1265_s1 + $0x58] sm:$0xff] }
  0x3a   : > { %v777_v57 = vpack.i.bf16 %v280_v54, %v282_v55  ;;  %v294_v5 = vsel %vm289_vm3, %v291_v59, %v293_v60  ;;  %v387_v8 = vsel %vm313_vm5, %v385_v63, %v386_v0  ;;  %v302_v9 = vrot.slane %v1010_v42, 3  ;;  %513 = vmatpush.msra.mxu1 %v473_v52  ;;  %v461_v54 = vld [vmem:[%s1265_s1 + $0x68] sm:$0xff]  ;;  %v471_v55 = vld [vmem:[%s1265_s1 + $0xb8] sm:$0xff]  ;;  %v458_v60 = vld [vmem:[%s1265_s1 + $0x50] sm:$0xff] }
  0x3b   : > { %v303_v10 = vrot.slane %v1020_v48, 3  ;;  %v305_v11 = vrot.slane %v1023_v49, 3  ;;  %v782_v12 = vpack.i.bf16 %v292_v4, %v294_v5  ;;  %v325_v13 = vrot.slane %v1010_v42, 5  ;;  %v469_v59 = vld [vmem:[%s1265_s1 + $0xa8] sm:$0xff]  ;;  %v467_v63 = vld [vmem:[%s1265_s1 + $0x98] sm:$0xff]  ;;  %v466_v1 = vld [vmem:[%s1265_s1 + $0x90] sm:$0xff] }
  0x3c   : > { %v326_v14 = vrot.slane %v1020_v48, 5  ;;  %v328_v15 = vrot.slane %v1023_v49, 5  ;;  %v409_v16 = vsel %vm336_vm6, %v407_v6, %v408_v7  ;;  %v314_v17 = vrot.slane %v1010_v42, 4  ;;  %514 = vmatpush.msra.mxu1 %v472_v53  ;;  %v454_v4 = vld [vmem:[%s1265_s1 + $0x30] sm:$0xff]  ;;  %v464_v5 = vld [vmem:[%s1265_s1 + $0x80] sm:$0xff]  ;;  %v453_v6 = vld [vmem:[%s1265_s1 + $0x28] sm:$0xff] }
  0x3d   : > { %v315_v18 = vrot.slane %v1020_v48, 4  ;;  %v317_v19 = vrot.slane %v1023_v49, 4  ;;  %v304_v20 = vsel %vm301_vm4, %v302_v9, %v303_v10  ;;  %v306_v21 = vsel %vm301_vm4, %v303_v10, %v305_v11  ;;  %v451_v9 = vld [vmem:[%s1265_s1 + $0x18] sm:$0xff]  ;;  %v450_v10 = vld [vmem:[%s1265_s1 + $0x10] sm:$0xff]  ;;  %v449_v11 = vld [vmem:[%s1265_s1 + $0x8] sm:$0xff] }
  0x3e   : > { %368 = vrot.lane.b32.xlu1 %v365_v56, %s899_s7  ;;  %v327_v22 = vsel %vm257_vm1, %v325_v13, %v326_v14  ;;  %v329_v23 = vsel %vm257_vm1, %v326_v14, %v328_v15  ;;  %v787_v26 = vpack.i.bf16 %v304_v20, %v306_v21  ;;  %v1081_v29 = vsel %vm257_vm1, %v269_v35, 0.0  ;;  %v460_v56 = vld [vmem:[%s1265_s1 + $0x60] sm:$0xff]  ;;  %515 = vmatpush.msra.mxu1 %v471_v55 }
  0x3f   : > { %778 = vrot.lane.b32.xlu0 %v777_v57, %s899_s7  ;;  %v316_v24 = vsel %vm313_vm5, %v314_v17, %v315_v18  ;;  %v318_v25 = vsel %vm313_vm5, %v315_v18, %v317_v19  ;;  %v797_v27 = vpack.i.bf16 %v327_v22, %v329_v23  ;;  %v337_v30 = vrot.slane %v1010_v42, 6  ;;  %v470_v57 = vld [vmem:[%s1265_s1 + $0xb0] sm:$0xff] }
  0x40   : > { %v792_v28 = vpack.i.bf16 %v316_v24, %v318_v25  ;;  %v338_v31 = vrot.slane %v1020_v48, 6  ;;  %v340_v32 = vrot.slane %v1023_v49, 6  ;;  %v377_v34 = vrot.slane %v1081_v29, 3  ;;  %516 = vmatpush.msra.mxu1 %v470_v57 }
  0x41   : > { %412 = vrot.lane.b32.xlu2 %v409_v16, %s902_s2  ;;  %v366_v36 = vrot.slane %v1081_v29, 2  ;;  %v410_v43 = vrot.slane %v1081_v29, 6  ;;  %v399_v45 = vrot.slane %v1081_v29, 5  ;;  %v388_v46 = vrot.slane %v1081_v29, 4 }
  0x42   : > { %v339_v33 = vsel %vm336_vm6, %v337_v30, %v338_v31  ;;  %v341_v35 = vsel %vm336_vm6, %v338_v31, %v340_v32  ;;  %v378_v37 = vsel %vm301_vm4, %v375_v62, %v377_v34  ;;  %517 = vmatpush.msra.mxu1 %v469_v59  ;;  %v457_v62 = vld [vmem:[%s1265_s1 + $0x48] sm:$0xff]  ;;  %v356_v16 = vrot.slane %v1001_v38, 1 }
  0x43   : > { %v802_v39 = vpack.i.bf16 %v339_v33, %v341_v35  ;;  %v367_v41 = vsel %vm289_vm3, %v364_v51, %v366_v36  ;;  %v411_v47 = vsel %vm336_vm6, %v408_v7, %v410_v43  ;;  %v400_v49 = vsel %vm257_vm1, %v397_v44, %v399_v45  ;;  %v463_v51 = vld [vmem:[%s1265_s1 + $0x78] sm:$0xff]  ;;  %v462_v44 = vld [vmem:[%s1265_s1 + $0x70] sm:$0xff]  ;;  %v452_v7 = vld [vmem:[%s1265_s1 + $0x20] sm:$0xff] }
  0x44   : > { %v389_v50 = vsel %vm313_vm5, %v386_v0, %v388_v46  ;;  %484 = vmatpush.msra.mxu0 %v463_v51  ;;  %690 = vmatpush.msra.mxu2 %v463_v51  ;;  %v456_v0 = vld [vmem:[%s1265_s1 + $0x40] sm:$0xff]  ;;  %v357_v17 = vrot.slane %v1006_v40, 1 }
  0x45   : > { %518 = vmatpush.msra.mxu1 %v468_v61 }
  0x46   : > { %390 = vrot.lane.b32.xlu1 %v387_v8, %s901_s13  ;;  %485 = vmatpush.msra.mxu0 %v462_v44  ;;  %v358_v20 = vsel %vm277_vm2, %v356_v16, %v357_v17 }
  0x47   : > { %783 = vrot.lane.b32.xlu0 %v782_v12, %s900_s8  ;;  %691 = vmatpush.msra.mxu2 %v462_v44  ;;  %v448_v12 = vld [vmem:[%s1265_s1] sm:$0xff] }
  0x48   : > { %486 = vmatpush.msra.mxu0 %v461_v54  ;;  %519 = vmatpush.msra.mxu1 %v467_v63 }
  0x49   : > { %793 = vrot.lane.b32.xlu2 %v792_v28, %s898_s6  ;;  %692 = vmatpush.msra.mxu2 %v461_v54 }
  0x4a   : > { %487 = vmatpush.msra.mxu0 %v460_v56  ;;  %520 = vmatpush.msra.mxu1 %v466_v1 }
  0x4b   : > { %693 = vmatpush.msra.mxu2 %v460_v56 }
  0x4c   : > { %488 = vmatpush.msra.mxu0 %v459_v58  ;;  %521 = vmatpush.msra.mxu1 %v465_v3 }
  0x4d   : > { %694 = vmatpush.msra.mxu2 %v459_v58 }
  0x4e   : > { %788 = vrot.lane.b32.xlu1 %v787_v26, %s901_s13  ;;  %489 = vmatpush.msra.mxu0 %v458_v60 }
  0x4f   : > { %798 = vrot.lane.b32.xlu0 %v797_v27, %s902_s2  ;;  %695 = vmatpush.msra.mxu2 %v458_v60 }
  0x50   : > { %490 = vmatpush.msra.mxu0 %v457_v62  ;;  %522 = vmatpush.msra.mxu1 %v464_v5 }
  0x51   : > { %803 = vrot.lane.b32.xlu2 %v802_v39, %s903_s20  ;;  %696 = vmatpush.msra.mxu2 %v457_v62  ;;  %s187_s20 = sand.u32 1, %s877_s15  }
  0x52   : > { %491 = vmatpush.msra.mxu0 %v456_v0  ;;  %s670_s22 = sshll.u32 %s187_s20, 4  ;;  %s571_s17 = scalar_lea.sflag [#allocation6], %s187_s20 }
  0x53   : > { %697 = vmatpush.msra.mxu2 %v456_v0  ;;  %s189_s27 = scalar_lea.vmem [#allocation5], %s670_s22 }
  0x54   : > { %492 = vmatpush.msra.mxu0 %v455_v2  ;;  %s583_s4 = sshll.u32 %s189_s27, 4  ;;  %s584_s4 = int_to_ptr.vmem [resolvable:$true] %s583_s4 }
  0x55   : > { %698 = vmatpush.msra.mxu2 %v455_v2 }
  0x56   : > { %381 = vrot.lane.b32.xlu1 %v378_v37, %s900_s8  ;;  %493 = vmatpush.msra.mxu0 %v454_v4 }
  0x57   : > { %370 = vrot.lane.b32.xlu0 %v367_v41, %s899_s7  ;;  %699 = vmatpush.msra.mxu2 %v454_v4 }
  0x58   : > { %494 = vmatpush.msra.mxu0 %v453_v6 }
  0x59   : > { %392 = vrot.lane.b32.xlu2 %v389_v50, %s901_s13  ;;  %700 = vmatpush.msra.mxu2 %v453_v6 }
  0x5a   : > { %495 = vmatpush.msra.mxu0 %v452_v7 }
  0x5b   : > { %701 = vmatpush.msra.mxu2 %v452_v7 }
  0x5c   : > { %496 = vmatpush.msra.mxu0 %v451_v9 }
  0x5d   : > { %702 = vmatpush.msra.mxu2 %v451_v9 }
  0x5e   : > { %414 = vrot.lane.b32.xlu1 %v411_v47, %s902_s2  ;;  %497 = vmatpush.msra.mxu0 %v450_v10  ;;  %s476_s2 = sld [smem:[#allocation4]] }
  0x5f   : > { %403 = vrot.lane.b32.xlu0 %v400_v49, %s898_s6  ;;  %703 = vmatpush.msra.mxu2 %v450_v10  ;;  %s829_s6 = sshra.s32 %s586_s5, 4  ;;  %s830_s6 = int_to_ptr.hbm [resolvable:$true] %s829_s6 }
  0x60   : > { %498 = vmatpush.msra.mxu0 %v449_v11  ;;  %s831_s7 = scalar_lea.hbm %s830_s6, 16  ;;  %p836_p1 = scmp.lt.s32.totalorder %s830_s6, %s1267_s3 }
  0x61   : > { %704 = vmatpush.msra.mxu2 %v449_v11  ;;  %p832_p12 = scmp.ne.s32.totalorder %s830_s6, %s831_s7  ;;  %p837_p2 = scmp.lt.s32.totalorder %s835_s10, %s831_s7 }
  0x62   : > { %499 = vmatpush.msra.mxu0 %v448_v12 }
  0x63   : > { %705 = vmatpush.msra.mxu2 %v448_v12  ;;  %p833_p13 = pnand %p832_p12, %p969_p4  ;;  %p838_p3 = por %p837_p2, %p836_p1 }
  0x65   : > { %p834_p0 = pneg %p833_p13 }
  0x67   : > { %p839_p5 = pnand %p838_p3, %p834_p0 }
  0x93   : > { %v380_v8 = vpop.permute.xlu2 %379 }
  0x9b   : > { %v413_v15 = vpop.permute.xlu2 %412 }
  0xa3   : > { %v794_v21 = vpop.permute.xlu2 %793 }
  0xa4   : > { %v796_v34 = vunpack.i.h.bf16 %v794_v21  ;;  %v795_v36 = vunpack.i.l.bf16 %v794_v21 }
  0xa8   : > { %v774_v13 = vpop.permute.xlu1 %773 }
  0xa9   : > { %v402_v14 = vpop.permute.xlu0 %401  ;;  %v776_v54 = vunpack.i.h.bf16 %v774_v13  ;;  %v775_v55 = vunpack.i.l.bf16 %v774_v13 }
  0xab   : > { %v804_v30 = vpop.permute.xlu2 %803 }
  0xac   : > { %v806_v35 = vunpack.i.h.bf16 %v804_v30  ;;  %v805_v37 = vunpack.i.l.bf16 %v804_v30 }
  0xb0   : > { %v369_v18 = vpop.permute.xlu1 %368 }
  0xb1   : > { %v779_v19 = vpop.permute.xlu0 %778  ;;  %v438_v22 = vsel %vm205_vm0, %v358_v20, %v369_v18 }
  0xb2   : > { %v440_v24 = vsel %vm420_vm7, %v438_v22, %v380_v8  ;;  %v781_v27 = vunpack.i.h.bf16 %v779_v19  ;;  %v780_v28 = vunpack.i.l.bf16 %v779_v19  ;;  %v477_v8 = vstv %s476_s2 }
  0xb3   : > { %v393_v2 = vpop.permute.xlu2 %392 }
  0xb4   : > { %v418_v39 = vsel %vm205_vm0, %v1010_v42, %v781_v27  ;;  %v419_v41 = vsel %vm205_vm0, %v1020_v48, %v780_v28  ;;  %v359_v48 = vrot.slane %v1081_v29, 1 }
  0xb6   : > { %v360_v62 = vsel %vm277_vm2, %v357_v17, %v359_v48 }
  0xb8   : > { %v391_v23 = vpop.permute.xlu1 %390 }
  0xb9   : > { %v442_v25 = vsel %vm423_vm8, %v440_v24, %v391_v23  ;;  %v784_v26 = vpop.permute.xlu0 %783 }
  0xba   : > { %v444_v38 = vsel %vm426_vm9, %v442_v25, %v402_v14  ;;  %v786_v31 = vunpack.i.h.bf16 %v784_v26  ;;  %v785_v32 = vunpack.i.l.bf16 %v784_v26 }
  0xbb   : > { %v446_v40 = vsel %vm429_vm10, %v444_v38, %v413_v15 }
  0xbc   : > { %679 = vmatmul.msk.f32.vlgmr.msra.gmra.mxu1 %vm432_vm11, %v446_v40  ;;  %v421_v47 = vsel %vm420_vm7, %v418_v39, %v786_v31  ;;  %v422_v49 = vsel %vm420_vm7, %v419_v41, %v785_v32 }
  0xc0   : > { %v789_v33 = vpop.permute.xlu1 %788 }
  0xc1   : > { %v791_v43 = vunpack.i.h.bf16 %v789_v33  ;;  %v790_v45 = vunpack.i.l.bf16 %v789_v33  ;;  %v799_v46 = vpop.permute.xlu0 %798 }
  0xc2   : > { %v801_v50 = vunpack.i.h.bf16 %v799_v46  ;;  %v800_v51 = vunpack.i.l.bf16 %v799_v46 }
  0xc3   : > { %v424_v52 = vsel %vm423_vm8, %v421_v47, %v791_v43  ;;  %v425_v44 = vsel %vm423_vm8, %v422_v49, %v790_v45 }
  0xc4   : > { %v427_v53 = vsel %vm426_vm9, %v424_v52, %v796_v34  ;;  %v428_v42 = vsel %vm426_vm9, %v425_v44, %v795_v36 }
  0xc5   : > { %v430_v56 = vsel %vm429_vm10, %v427_v53, %v801_v50  ;;  %v431_v57 = vsel %vm429_vm10, %v428_v42, %v800_v51 }
  0xc6   : > { %v433_v58 = vsel %vm432_vm11, %v430_v56, %v806_v35  ;;  %v434_v59 = vsel %vm432_vm11, %v431_v57, %v805_v37 }
  0xc7   : > { %v436_v60 = vsel %vm435_vm12, %v433_v58, %v776_v54  ;;  %v437_v61 = vsel %vm435_vm12, %v434_v59, %v775_v55 }
  0xc8   : > { %500 = vmatmul.f32.vlgmr.msra.gmra.mxu0 %v436_v60  ;;  %503 = vmatmul.f32.vlgmr.msra.gmra.mxu2 %v437_v61  ;;  %v382_v63 = vpop.permute.xlu1 %381 }
  0xc9   : > { %v371_v0 = vpop.permute.xlu0 %370 }
  0xca   : > { %v439_v29 = vsel %vm205_vm0, %v360_v62, %v371_v0 }
  0xcb   : > { %v441_v1 = vsel %vm420_vm7, %v439_v29, %v382_v63 }
  0xcc   : > { %v443_v4 = vsel %vm423_vm8, %v441_v1, %v393_v2 }
  0xd0   : > { %v415_v3 = vpop.permute.xlu1 %414 }
  0xd1   : > { %v404_v5 = vpop.permute.xlu0 %403 }
  0xd2   : > { %v445_v6 = vsel %vm426_vm9, %v443_v4, %v404_v5 }
  0xd3   : > { %v447_v7 = vsel %vm429_vm10, %v445_v6, %v415_v3 }
  0xd4   : > { %680 = vmatmul.msk.f32.gmra.mxu1 %vm432_vm11, %v447_v7 }
 0x139   : > { %v524_v11 = vpop.f32.mrf.mxu1 }
 0x145   : > { %v501_v9 = vpop.f32.mrf.mxu0 }
 0x146   : > { %v502_v10 = vadd.f32 %v501_v9, %v477_v8 }
 0x148   : > { %v525_v12 = vadd.f32 %v524_v11, %v502_v10 }
 0x14a   : > { %v681_v13 = vmul.f32 -1.442695, %v525_v12 }
 0x14b   : > { %v504_v14 = vpop.f32.mrf.mxu2 }
 0x14c   : > { %807 = vpow2.f32 %v681_v13  ;;  %v505_v15 = vadd.f32 %v504_v14, %v477_v8 }
 0x151   : > { %v527_v16 = vpop.f32.mrf.mxu1 }
 0x152   : > { %v808_v17 = vpop.eup %807  ;;  %v528_v18 = vadd.f32 %v527_v16, %v505_v15 }
 0x153   : > { %v536_v19 = vadd.f32 1.0, %v808_v17 }
 0x154   : > { %v682_v20 = vmul.f32 -1.442695, %v528_v18 }
 0x155   : > { %809 = vrcp.f32 %v536_v19  ;;  %v549_v26 = vand.u32 2147483648, %v536_v19  ;;  %v547_v40 = vand.u32 2147483647, %v536_v19  ;;  %vm543_vm14 = vweird.f32 %v536_v19 }
 0x156   : > { %811 = vpow2.f32 %v682_v20 }
 0x157   : > { %v550_v28 = vor.u32 1.1754944e-38, %v549_v26  ;;  %vm548_vm1 = vcmp.eq.f32.partialorder %v547_v40, 8.507059e+37 }
 0x15b   : > { %v810_v21 = vpop.eup %809 }
 0x15c   : > { %v812_v22 = vpop.eup %811  ;;  %v539_v23 = vmul.f32 %v810_v21, %v536_v19  ;;  %vm544_vm13 = vweird.f32 %v810_v21 }
 0x15d   : > { %v537_v24 = vadd.f32 1.0, %v812_v22  ;;  %vm545_vm15 = vmor %vm543_vm14, %vm544_vm13 }
 0x15e   : > { %v540_v25 = vsub.f32 1.0, %v539_v23 }
 0x15f   : > { %813 = vrcp.f32 %v537_v24  ;;  %v564_v33 = vand.u32 2147483648, %v537_v24  ;;  %v562_v37 = vand.u32 2147483647, %v537_v24  ;;  %vm558_vm3 = vweird.f32 %v537_v24 }
 0x160   : > { %v541_v38 = vmul.f32 %v810_v21, %v540_v25 }
 0x161   : > { %v565_v41 = vor.u32 1.1754944e-38, %v564_v33  ;;  %vm563_vm5 = vcmp.eq.f32.partialorder %v562_v37, 8.507059e+37 }
 0x162   : > { %v542_v27 = vadd.f32 %v810_v21, %v541_v38 }
 0x164   : > { %v546_v30 = vsel %vm545_vm15, %v810_v21, %v542_v27 }
 0x165   : > { %v814_v31 = vpop.eup %813  ;;  %v551_v32 = vsel %vm548_vm1, %v550_v28, %v546_v30 }
 0x166   : > { %v554_v34 = vmul.f32 %v814_v31, %v537_v24  ;;  %568 = vst.msk [vmem:[%s189_s27] sm:$0xff] %vm205_vm0, %v551_v32  ;;  %vm559_vm2 = vweird.f32 %v814_v31 }
 0x167   : > { %vm560_vm4 = vmor %vm558_vm3, %vm559_vm2 }
 0x168   : > { %v555_v36 = vsub.f32 1.0, %v554_v34 }
 0x16a   : > { %v556_v35 = vmul.f32 %v814_v31, %v555_v36 }
 0x16c   : > { %v557_v39 = vadd.f32 %v814_v31, %v556_v35 }
 0x16e   : > { %v561_v43 = vsel %vm560_vm4, %v814_v31, %v557_v39 }
 0x16f   : > { %v566_v45 = vsel %vm563_vm5, %v565_v41, %v561_v43 }
 0x170   : > { %569 = vst.msk [vmem:[%s189_s27 + $0x8] sm:$0xff] %vm205_vm0, %v566_v45 }
 0x171   : > { %842 = shalt.err (!%p839_p5)
}
 0x172   : > { %s904_s13 = smov 128   ;;  %s905_s2 = smov 8  }
 0x173   : > { %706 = dma.vmem_to_hbm [thread:$0]  (%p969_p4), %s584_s4, 256, %s586_s5, %s571_s17, %s904_s13, %s904_s13, %s905_s2  }
 0x174 PF: > { %p712_p6 = scmp.ge.s32.totalorder %s893_s19, 2  ;;  %s600_s20 = sand.u32 1, %s873_s14  }
 0x175   : > { %s601_s22 = scalar_lea.sflag [#allocation6], %s600_s20 }
 0x176   : > { %p709_p7 = pnand %p712_p6, %p976_p8 }
 0x178   : > { %p710_p9 = pneg %p709_p7 }
 0x17a   : > { %868 = dma.done.wait (%p710_p9), %s601_s22, 256  }
 0x17b   : > { %870 = vsyncadd (%p710_p9), %s601_s22, 4294967040  ;;  %s17_s19 = sadd.s32 1, %s893_s19   ;;  %s1270_s14 = smov %s877_s15 }
 0x17c   : > { %p14_p10 = scmp.ge.s32.totalorder %s17_s19, 4   ;;  %s1271_s15 = smov %s881_s16 }
 0x17d   : > { %s1272_s16 = smov %s982_s26  ;;  %s1273_s17 = smov %s889_s18 }
 0x17e   : > { %s1274_s18 = smov %s1276_s21  ;;  %16 = sbr.rel (!%p14_p10) target bundleno = 6 (0x6), region = 78 }
 0x183   :  { %607 = vsyncpa [#allocation6], 1 }
 0x184   :  { %609 = vsyncpa [#allocation6 + $0x1], 1 }

</bundles_post_ra>
